<compile_context>
chip_gen: v5e
topology: v5e:2x2
jax: 0.10.0
libtpu: 0.0.40
codegen_flags: <defaults>
</compile_context>

<pallas_src>
import jax
import jax.numpy as jnp
from jax.experimental import pallas as pl
from jax.experimental.pallas import tpu as pltpu

OUT_LANES = 128  # lane-dense padded output width: q1 in lane 0, q2 in lane 1


def _qnet_fused_kernel(s_ref, a_ref,
                       w1s_ref, w1a_ref, b1_ref,
                       w2_ref, b2_ref,
                       w3_ref, b3_ref,
                       out_ref):
    # Layer 1 (both heads at once). No concat needed:
    #   [state|action] @ W1 == state @ W1[:state_dim] + action @ W1[state_dim:]
    h = (jnp.dot(s_ref[...], w1s_ref[...], preferred_element_type=jnp.float32)
         + jnp.dot(a_ref[...], w1a_ref[...], preferred_element_type=jnp.float32)
         + b1_ref[...])
    h = jnp.maximum(h, 0.0)
    # Layer 2: block-diagonal fused weight keeps the two heads independent.
    h = jnp.dot(h, w2_ref[...], preferred_element_type=jnp.float32) + b2_ref[...]
    h = jnp.maximum(h, 0.0)
    # Layer 3: fused, zero-padded to 128 lanes -> unmasked lane-dense stores.
    out_ref[...] = (jnp.dot(h, w3_ref[...], preferred_element_type=jnp.float32)
                    + b3_ref[...])


def fuse_params(params, state_dim):
    """One-time packing of the 12 per-head tensors into 7 fused arrays."""
    (w1a, b1a, w2a, b2a, w3a, b3a) = params["q1"]
    (w1b, b1b, w2b, b2b, w3b, b3b) = params["q2"]
    hidden = w1a.shape[1]

    w1 = jnp.concatenate([w1a, w1b], axis=1)            # (in_dim, 2H)
    w1_state = w1[:state_dim]                            # (state_dim, 2H)
    w1_action = w1[state_dim:]                           # (action_dim, 2H)
    b1 = jnp.concatenate([b1a, b1b], axis=1)             # (1, 2H)

    w2 = jnp.zeros((2 * hidden, 2 * hidden), jnp.float32)
    w2 = w2.at[:hidden, :hidden].set(w2a).at[hidden:, hidden:].set(w2b)
    b2 = jnp.concatenate([b2a, b2b], axis=1)             # (1, 2H)

    w3 = jnp.zeros((2 * hidden, OUT_LANES), jnp.float32)
    w3 = w3.at[:hidden, 0].set(w3a[:, 0]).at[hidden:, 1].set(w3b[:, 0])
    b3 = jnp.zeros((1, OUT_LANES), jnp.float32)
    b3 = b3.at[0, 0].set(b3a[0, 0]).at[0, 1].set(b3b[0, 0])

    return (w1_state, w1_action, b1, w2, b2, w3, b3)


def qnetwork_forward(state, action, fused, tile_b=512):
    """Returns (q1, q2), each (batch, 1) float32. `fused` is from fuse_params()."""
    batch, state_dim = state.shape
    action_dim = action.shape[1]
    w1s, w1a, b1, w2, b2, w3, b3 = fused
    two_h = b1.shape[1]

    # Batch tiling: whole batch in one block if small, else 512-row tiles
    # (double-buffered, well under v7x's 32 MiB scoped VMEM budget).
    if batch <= tile_b:
        tb = batch
        padded = batch
    else:
        tb = tile_b
        padded = pl.cdiv(batch, tb) * tb
    if padded != batch:
        pad = padded - batch
        state = jnp.pad(state, ((0, pad), (0, 0)))
        action = jnp.pad(action, ((0, pad), (0, 0)))

    grid = (padded // tb,)

    def row_map(i):
        return (i, 0)

    def const_map(i):
        return (0, 0)

    flops = 2 * padded * (state_dim * two_h + action_dim * two_h
                          + two_h * two_h + two_h * OUT_LANES)
    bytes_accessed = 4 * (state.size + action.size
                          + sum(int(p.size) for p in fused)
                          + padded * OUT_LANES)

    out = pl.pallas_call(
        _qnet_fused_kernel,
        out_shape=jax.ShapeDtypeStruct((padded, OUT_LANES), jnp.float32),
        grid=grid,
        in_specs=[
            pl.BlockSpec((tb, state_dim), row_map),
            pl.BlockSpec((tb, action_dim), row_map),
            pl.BlockSpec(w1s.shape, const_map),
            pl.BlockSpec(w1a.shape, const_map),
            pl.BlockSpec(b1.shape, const_map),
            pl.BlockSpec(w2.shape, const_map),
            pl.BlockSpec(b2.shape, const_map),
            pl.BlockSpec(w3.shape, const_map),
            pl.BlockSpec(b3.shape, const_map),
        ],
        out_specs=pl.BlockSpec((tb, OUT_LANES), row_map),
        compiler_params=pltpu.CompilerParams(
            dimension_semantics=("parallel",)),
        cost_estimate=pl.CostEstimate(
            flops=flops, transcendentals=0, bytes_accessed=bytes_accessed),
    )(state, action, w1s, w1a, b1, w2, b2, w3, b3)

    q1 = out[:batch, 0:1]
    q2 = out[:batch, 1:2]
    return q1, q2


def init_params(key, state_dim, action_dim, hidden_dim):
    in_dim = state_dim + action_dim
    keys = jax.random.split(key, 12)

    def linear(kw, kb, fan_in, fan_out):
        # deterministic synthetic init (uniform, PyTorch-like bound)
        bound = 1.0 / jnp.sqrt(float(fan_in))
        w = jax.random.uniform(kw, (fan_in, fan_out), jnp.float32, -bound, bound)
        b = jax.random.uniform(kb, (1, fan_out), jnp.float32, -bound, bound)
        return w, b

    def head(ks):
        w1, b1 = linear(ks[0], ks[1], in_dim, hidden_dim)
        w2, b2 = linear(ks[2], ks[3], hidden_dim, hidden_dim)
        w3, b3 = linear(ks[4], ks[5], hidden_dim, 1)
        return (w1, b1, w2, b2, w3, b3)

    return {"q1": head(keys[:6]), "q2": head(keys[6:])}


def _reference_forward(state, action, params):
    sa = jnp.concatenate([state, action], axis=1)

    def mlp(p):
        w1, b1, w2, b2, w3, b3 = p
        h = jnp.maximum(sa @ w1 + b1, 0.0)
        h = jnp.maximum(h @ w2 + b2, 0.0)
        return h @ w3 + b3

    return mlp(params["q1"]), mlp(params["q2"])


if __name__ == "__main__":
    state_dim, action_dim, hidden_dim, batch = 8, 4, 32, 2

    key = jax.random.PRNGKey(0)
    k_state, k_action, k_params = jax.random.split(key, 3)

    state = jax.random.normal(k_state, (batch, state_dim), jnp.float32)
    action = jax.random.normal(k_action, (batch, action_dim), jnp.float32)
    params = init_params(k_params, state_dim, action_dim, hidden_dim)

    fused = fuse_params(params, state_dim)  # one-time param packing
    q1, q2 = qnetwork_forward(state, action, fused)
    jax.block_until_ready((q1, q2))

    r1, r2 = _reference_forward(state, action, params)
    assert q1.shape == (batch, 1) and q2.shape == (batch, 1)
    assert jnp.allclose(q1, r1, atol=1e-5) and jnp.allclose(q2, r2, atol=1e-5)

    print("KERNEL_OK")
</pallas_src>

<mosaic_0001>
module attributes {stable_mosaic.version = 11 : i64} {
  func.func @_qnet_fused_kernel(%arg0: i32, %arg1: memref<2x8xf32, #tpu.memory_space<vmem>>, %arg2: memref<2x4xf32, #tpu.memory_space<vmem>>, %arg3: memref<8x64xf32, #tpu.memory_space<vmem>>, %arg4: memref<4x64xf32, #tpu.memory_space<vmem>>, %arg5: memref<1x64xf32, #tpu.memory_space<vmem>>, %arg6: memref<64x64xf32, #tpu.memory_space<vmem>>, %arg7: memref<1x64xf32, #tpu.memory_space<vmem>>, %arg8: memref<64x128xf32, #tpu.memory_space<vmem>>, %arg9: memref<1x128xf32, #tpu.memory_space<vmem>>, %arg10: memref<2x128xf32, #tpu.memory_space<vmem>>) attributes {dimension_semantics = [#tpu.dimension_semantics<parallel>], iteration_bounds = array<i64: 1>, scalar_prefetch = 0 : i64, scratch_operands = 0 : i64, tpu.core_type = #tpu.core_type<tc>, window_params = [{transform_indices = @transform_0, window_bounds = array<i64: 2, 8>}, {transform_indices = @transform_1, window_bounds = array<i64: 2, 4>}, {pipeline_mode = #tpu.pipeline_mode<synchronous>, transform_indices = @transform_2, window_bounds = array<i64: 8, 64>}, {pipeline_mode = #tpu.pipeline_mode<synchronous>, transform_indices = @transform_3, window_bounds = array<i64: 4, 64>}, {pipeline_mode = #tpu.pipeline_mode<synchronous>, transform_indices = @transform_4, window_bounds = array<i64: 1, 64>}, {pipeline_mode = #tpu.pipeline_mode<synchronous>, transform_indices = @transform_5, window_bounds = array<i64: 64, 64>}, {pipeline_mode = #tpu.pipeline_mode<synchronous>, transform_indices = @transform_6, window_bounds = array<i64: 1, 64>}, {pipeline_mode = #tpu.pipeline_mode<synchronous>, transform_indices = @transform_7, window_bounds = array<i64: 64, 128>}, {pipeline_mode = #tpu.pipeline_mode<synchronous>, transform_indices = @transform_8, window_bounds = array<i64: 1, 128>}, {transform_indices = @transform_9, window_bounds = array<i64: 2, 128>}]} {
    %c0 = arith.constant 0 : index
    %c0_0 = arith.constant 0 : index
    %0 = vector.load %arg1[%c0, %c0_0] : memref<2x8xf32, #tpu.memory_space<vmem>>, vector<2x8xf32>
    %c0_1 = arith.constant 0 : index
    %c0_2 = arith.constant 0 : index
    %1 = vector.load %arg3[%c0_1, %c0_2] : memref<8x64xf32, #tpu.memory_space<vmem>>, vector<8x64xf32>
    %cst = arith.constant dense<0.000000e+00> : vector<2x64xf32>
    %2 = tpu.matmul %0, %1, %cst {dimension_numbers = #tpu.dot_dimension_numbers<[1], [0], [0], [1], [0, 0, 1, 1], [], []>} : vector<2x8xf32>, vector<8x64xf32>, vector<2x64xf32> -> vector<2x64xf32>
    %c0_3 = arith.constant 0 : index
    %c0_4 = arith.constant 0 : index
    %3 = vector.load %arg2[%c0_3, %c0_4] : memref<2x4xf32, #tpu.memory_space<vmem>>, vector<2x4xf32>
    %c0_5 = arith.constant 0 : index
    %c0_6 = arith.constant 0 : index
    %4 = vector.load %arg4[%c0_5, %c0_6] : memref<4x64xf32, #tpu.memory_space<vmem>>, vector<4x64xf32>
    %cst_7 = arith.constant dense<0.000000e+00> : vector<2x64xf32>
    %5 = tpu.matmul %3, %4, %cst_7 {dimension_numbers = #tpu.dot_dimension_numbers<[1], [0], [0], [1], [0, 0, 1, 1], [], []>} : vector<2x4xf32>, vector<4x64xf32>, vector<2x64xf32> -> vector<2x64xf32>
    %6 = arith.addf %2, %5 : vector<2x64xf32>
    %c0_8 = arith.constant 0 : index
    %c0_9 = arith.constant 0 : index
    %7 = vector.load %arg5[%c0_8, %c0_9] : memref<1x64xf32, #tpu.memory_space<vmem>>, vector<1x64xf32>
    %8 = vector.broadcast %7 : vector<1x64xf32> to vector<2x64xf32>
    %9 = arith.addf %6, %8 : vector<2x64xf32>
    %cst_10 = arith.constant 0.000000e+00 : f32
    %10 = vector.broadcast %cst_10 : f32 to vector<2x64xf32>
    %11 = arith.maximumf %9, %10 : vector<2x64xf32>
    %c0_11 = arith.constant 0 : index
    %c0_12 = arith.constant 0 : index
    %12 = vector.load %arg6[%c0_11, %c0_12] : memref<64x64xf32, #tpu.memory_space<vmem>>, vector<64x64xf32>
    %cst_13 = arith.constant dense<0.000000e+00> : vector<2x64xf32>
    %13 = tpu.matmul %11, %12, %cst_13 {dimension_numbers = #tpu.dot_dimension_numbers<[1], [0], [0], [1], [0, 0, 1, 1], [], []>} : vector<2x64xf32>, vector<64x64xf32>, vector<2x64xf32> -> vector<2x64xf32>
    %c0_14 = arith.constant 0 : index
    %c0_15 = arith.constant 0 : index
    %14 = vector.load %arg7[%c0_14, %c0_15] : memref<1x64xf32, #tpu.memory_space<vmem>>, vector<1x64xf32>
    %15 = vector.broadcast %14 : vector<1x64xf32> to vector<2x64xf32>
    %16 = arith.addf %13, %15 : vector<2x64xf32>
    %cst_16 = arith.constant 0.000000e+00 : f32
    %17 = vector.broadcast %cst_16 : f32 to vector<2x64xf32>
    %18 = arith.maximumf %16, %17 : vector<2x64xf32>
    %c0_17 = arith.constant 0 : index
    %c0_18 = arith.constant 0 : index
    %19 = vector.load %arg8[%c0_17, %c0_18] : memref<64x128xf32, #tpu.memory_space<vmem>>, vector<64x128xf32>
    %cst_19 = arith.constant dense<0.000000e+00> : vector<2x128xf32>
    %20 = tpu.matmul %18, %19, %cst_19 {dimension_numbers = #tpu.dot_dimension_numbers<[1], [0], [0], [1], [0, 0, 1, 1], [], []>} : vector<2x64xf32>, vector<64x128xf32>, vector<2x128xf32> -> vector<2x128xf32>
    %c0_20 = arith.constant 0 : index
    %c0_21 = arith.constant 0 : index
    %21 = vector.load %arg9[%c0_20, %c0_21] : memref<1x128xf32, #tpu.memory_space<vmem>>, vector<1x128xf32>
    %22 = vector.broadcast %21 : vector<1x128xf32> to vector<2x128xf32>
    %23 = arith.addf %20, %22 : vector<2x128xf32>
    %c0_22 = arith.constant 0 : index
    %c0_23 = arith.constant 0 : index
    %24 = vector.load %arg10[%c0_22, %c0_23] : memref<2x128xf32, #tpu.memory_space<vmem>>, vector<2x128xf32>
    tpu.vector_store %arg10[%c0_22, %c0_23], %23 {strides = array<i32>} : memref<2x128xf32, #tpu.memory_space<vmem>>, vector<2x128xf32>,
    return
  }
  func.func @transform_0(%arg0: i32) -> (i32, i32) {
    %c0_i32 = arith.constant 0 : i32
    %c0_i32_0 = arith.constant 0 : i32
    return %arg0, %c0_i32 : i32, i32
  }
  func.func @transform_1(%arg0: i32) -> (i32, i32) {
    %c0_i32 = arith.constant 0 : i32
    %c0_i32_0 = arith.constant 0 : i32
    return %arg0, %c0_i32 : i32, i32
  }
  func.func @transform_2(%arg0: i32) -> (i32, i32) {
    %c0_i32 = arith.constant 0 : i32
    %c0_i32_0 = arith.constant 0 : i32
    %c0_i32_1 = arith.constant 0 : i32
    return %c0_i32, %c0_i32_0 : i32, i32
  }
  func.func @transform_3(%arg0: i32) -> (i32, i32) {
    %c0_i32 = arith.constant 0 : i32
    %c0_i32_0 = arith.constant 0 : i32
    %c0_i32_1 = arith.constant 0 : i32
    return %c0_i32, %c0_i32_0 : i32, i32
  }
  func.func @transform_4(%arg0: i32) -> (i32, i32) {
    %c0_i32 = arith.constant 0 : i32
    %c0_i32_0 = arith.constant 0 : i32
    %c0_i32_1 = arith.constant 0 : i32
    return %c0_i32, %c0_i32_0 : i32, i32
  }
  func.func @transform_5(%arg0: i32) -> (i32, i32) {
    %c0_i32 = arith.constant 0 : i32
    %c0_i32_0 = arith.constant 0 : i32
    %c0_i32_1 = arith.constant 0 : i32
    return %c0_i32, %c0_i32_0 : i32, i32
  }
  func.func @transform_6(%arg0: i32) -> (i32, i32) {
    %c0_i32 = arith.constant 0 : i32
    %c0_i32_0 = arith.constant 0 : i32
    %c0_i32_1 = arith.constant 0 : i32
    return %c0_i32, %c0_i32_0 : i32, i32
  }
  func.func @transform_7(%arg0: i32) -> (i32, i32) {
    %c0_i32 = arith.constant 0 : i32
    %c0_i32_0 = arith.constant 0 : i32
    %c0_i32_1 = arith.constant 0 : i32
    return %c0_i32, %c0_i32_0 : i32, i32
  }
  func.func @transform_8(%arg0: i32) -> (i32, i32) {
    %c0_i32 = arith.constant 0 : i32
    %c0_i32_0 = arith.constant 0 : i32
    %c0_i32_1 = arith.constant 0 : i32
    return %c0_i32, %c0_i32_0 : i32, i32
  }
  func.func @transform_9(%arg0: i32) -> (i32, i32) {
    %c0_i32 = arith.constant 0 : i32
    %c0_i32_0 = arith.constant 0 : i32
    return %arg0, %c0_i32 : i32, i32
  }
}

</mosaic_0001>

<bundles_post_ra>
// kernel: tpu_custom_call.1
= control target key start
LH: loop header
LB: loop body
LE: loop exit
PB: predicated region body
PF: predicated region fallthrough
CT: control target
= control target key end

     0   :  { %14 = vsyncpa [#allocation3], 0  ;;  %s558_s0 = inlined_call_operand.hbm [shape: f32[2,8], index: 0, kind: input, shape index: {}]   ;;  %s559_s1 = inlined_call_operand.hbm [shape: f32[2,4], index: 1, kind: input, shape index: {}]   ;;  %s560_s2 = inlined_call_operand.hbm [shape: f32[8,64], index: 2, kind: input, shape index: {}]   ;;  %s561_s3 = inlined_call_operand.hbm [shape: f32[4,64], index: 3, kind: input, shape index: {}]   ;;  %s562_s4 = inlined_call_operand.vmem [shape: f32[1,64], index: 4, kind: input, shape index: {}]   ;;  %s563_s5 = inlined_call_operand.hbm [shape: f32[64,64], index: 5, kind: input, shape index: {}]   ;;  %s564_s6 = inlined_call_operand.vmem [shape: f32[1,64], index: 6, kind: input, shape index: {}]   ;;  %s565_s7 = inlined_call_operand.hbm [shape: f32[64,128], index: 7, kind: input, shape index: {}]   ;;  %s566_s8 = inlined_call_operand.vmem [shape: f32[1,128], index: 8, kind: input, shape index: {}]   ;;  %s567_s9 = inlined_call_operand.hbm [shape: f32[2,128], index: 9, kind: output, shape index: {}]  }
   0x1   :  { %15 = vsyncpa [#allocation6], 0 }
   0x2   :  { %16 = vsyncpa [#allocation9], 0 }
   0x3   :  { %17 = vsyncpa [#allocation12], 0  ;;  %s35_s11 = sshll.u32 %s559_s1, 4  ;;  %s36_s11 = int_to_ptr.hbm [resolvable:$true] %s35_s11 }
   0x4   :  { %18 = vsyncpa [#allocation4], 0  ;;  %s469_s12 = smov [#allocation5]   ;;  %s57_s16 = sshll.u32 %s561_s3, 4  ;;  %s58_s16 = int_to_ptr.hbm [resolvable:$true] %s57_s16 }
   0x5   :  { %s37_s13 = sshll.u32 %s469_s12, 4  ;;  %s470_s17 = smov [#allocation8]   ;;  %s38_s13 = int_to_ptr.vmem [resolvable:$true] %s37_s13 }
   0x6   :  { %40 = dma.hbm_to_vmem [thread:$0]  %s36_s11, 32, %s38_s13, [#allocation6]  }
   0x7   :  { %s59_s18 = sshll.u32 %s470_s17, 4  ;;  %s24_s21 = sshll.u32 %s558_s0, 4  ;;  %s60_s18 = int_to_ptr.vmem [resolvable:$true] %s59_s18  ;;  %s25_s21 = int_to_ptr.hbm [resolvable:$true] %s24_s21 }
   0x8   :  { %62 = dma.hbm_to_vmem [thread:$0]  %s58_s16, 64, %s60_s18, [#allocation9]  }
   0x9   :  { %s46_s23 = sshll.u32 %s560_s2, 4  ;;  %s471_s24 = smov [#allocation2]   ;;  %s47_s23 = int_to_ptr.hbm [resolvable:$true] %s46_s23 }
   0xa   :  { %s26_s25 = sshll.u32 %s471_s24, 4  ;;  %s472_s3 = smov [#allocation7]   ;;  %s27_s25 = int_to_ptr.vmem [resolvable:$true] %s26_s25 }
   0xb   :  { %29 = dma.hbm_to_vmem [thread:$0]  %s25_s21, 32, %s27_s25, [#allocation3]  }
   0xc   :  { %s48_s26 = sshll.u32 %s472_s3, 4  ;;  %s69_s29 = sshll.u32 %s563_s5, 4  ;;  %s49_s26 = int_to_ptr.vmem [resolvable:$true] %s48_s26  ;;  %s70_s29 = int_to_ptr.hbm [resolvable:$true] %s69_s29 }
   0xd   :  { %51 = dma.hbm_to_vmem [thread:$0]  %s47_s23, 128, %s49_s26, [#allocation6]  }
   0xe   :  { %s473_s0 = smov [#allocation10]   ;;  %s84_s2 = sshll.u32 %s565_s7, 4  ;;  %s85_s2 = int_to_ptr.hbm [resolvable:$true] %s84_s2 }
   0xf   :  { %s71_s30 = sshll.u32 %s473_s0, 4  ;;  %s474_s12 = smov 128   ;;  %s72_s30 = int_to_ptr.vmem [resolvable:$true] %s71_s30 }
  0x10   :  { %s475_s13 = smov 8   ;;  %s476_s14 = smov [#allocation11]  }
  0x11   :  { %77 = dma.hbm_to_vmem [thread:$0]  %s70_s29, 1024, %s72_s30, [#allocation9], %s474_s12, %s474_s12, %s475_s13  }
  0x12   :  { %s86_s15 = sshll.u32 %s476_s14, 4  ;;  %s87_s15 = int_to_ptr.vmem [resolvable:$true] %s86_s15 }
  0x13   :  { %92 = dma.hbm_to_vmem [thread:$0]  %s85_s2, 1024, %s87_s15, [#allocation12], %s474_s12, %s474_s12, %s475_s13  }
  0x14   :  { %459 = dma.done.wait [#allocation3], 32  }
  0x15   :  { %460 = vsyncadd [#allocation3], 4294967264 }
  0x16   :  { %461 = dma.done.wait [#allocation6], 160  }
  0x17   :  { %462 = vsyncadd [#allocation6], 4294967136 }
  0x18   :  { %463 = dma.done.wait [#allocation9], 1088  }
  0x19   :  { %464 = vsyncadd [#allocation9], 4294966208 }
  0x1a   :  { %465 = dma.done.wait [#allocation12], 1024  }
  0x1b   :  { %466 = vsyncadd [#allocation12], 4294966272  ;;  %vm127_vm0 = vcmask 1043456   ;;  %vm123_vm1 = vcmask 31744   ;;  %vm151_vm2 = vcmask 64512   ;;  %v120_v1 = vld [vmem:[#allocation7] sm:$0xff] }
  0x1c   :  { %v122_v0 = vld [vmem:[#allocation8] sm:$0xf]  ;;  %v121_v2 = vld [vmem:[#allocation5] sm:$0x3]  ;;  %170 = vmatpush.msra.mxu1 %v120_v1  ;;  %v119_v3 = vld [vmem:[#allocation2] sm:$0x3] }
  0x1d   :  { %274 = vmatpush.msk.msra.mxu0 %vm127_vm0, %v122_v0  ;;  %v188_v4 = vld [vmem:[#allocation10 + $0x38] sm:$0xff]  ;;  %276 = vmatmul.msk.f32.vlgmr.msra.gmra.mxu1 %vm151_vm2, %v119_v3  ;;  %v187_v5 = vld [vmem:[#allocation10 + $0x30] sm:$0xff]  ;;  %v186_v6 = vld [vmem:[#allocation10 + $0x28] sm:$0xff]  ;;  %vm193_vm3 = vcmask 523264   ;;  %s477_s19 = smov [#allocation13]   ;;  %s261_s22 = sshll.u32 %s567_s9, 4  ;;  %s262_s22 = int_to_ptr.hbm [resolvable:$true] %s261_s22 }
  0x1e   :  { %275 = vmatmul.msk.f32.vlgmr.msra.gmra.mxu0 %vm123_vm1, %v121_v2  ;;  %205 = vmatpush.msra.mxu2 %v188_v4  ;;  %v185_v7 = vld [vmem:[#allocation10 + $0x20] sm:$0xff]  ;;  %v184_v8 = vld [vmem:[#allocation10 + $0x18] sm:$0xff]  ;;  %v183_v9 = vld [vmem:[#allocation10 + $0x10] sm:$0xff]  ;;  %s259_s20 = sshll.u32 %s477_s19, 4  ;;  %s260_s20 = int_to_ptr.vmem [resolvable:$true] %s259_s20 }
  0x1f   :  { %v182_v10 = vld [vmem:[#allocation10 + $0x8] sm:$0xff]  ;;  %v181_v11 = vld [vmem:[#allocation10] sm:$0xff]  ;;  %v225_v12 = vld [vmem:[#allocation11 + $0x38] sm:$0xff] }
  0x20   :  { %206 = vmatpush.msra.mxu2 %v187_v5  ;;  %v224_v13 = vld [vmem:[#allocation11 + $0x30] sm:$0xff]  ;;  %241 = vmatpush.msra.mxu3 %v225_v12  ;;  %v223_v14 = vld [vmem:[#allocation11 + $0x28] sm:$0xff]  ;;  %v222_v15 = vld [vmem:[#allocation11 + $0x20] sm:$0xff] }
  0x21   :  { %v221_v16 = vld [vmem:[#allocation11 + $0x18] sm:$0xff]  ;;  %v288_v17 = vld [vmem:[%s562_s4] ss:$0 sm:$0xff]  ;;  %v219_v24 = vld [vmem:[#allocation11 + $0x8] sm:$0xff] }
  0x22   :  { %207 = vmatpush.msra.mxu2 %v186_v6  ;;  %242 = vmatpush.msra.mxu3 %v224_v13  ;;  %v220_v23 = vld [vmem:[#allocation11 + $0x10] sm:$0xff]  ;;  %v218_v25 = vld [vmem:[#allocation11] sm:$0xff] }
  0x23   :  { %v289_v26 = vld [vmem:[%s564_s6] ss:$0 sm:$0xff] }
  0x24   :  { %208 = vmatpush.msra.mxu2 %v185_v7  ;;  %243 = vmatpush.msra.mxu3 %v223_v14  ;;  %v290_v30 = vld [vmem:[%s566_s8] ss:$0 sm:$0xff] }
  0x26   :  { %209 = vmatpush.msra.mxu2 %v184_v8  ;;  %244 = vmatpush.msra.mxu3 %v222_v15 }
  0x28   :  { %210 = vmatpush.msra.mxu2 %v183_v9  ;;  %245 = vmatpush.msra.mxu3 %v221_v16 }
  0x2a   :  { %211 = vmatpush.msra.mxu2 %v182_v10  ;;  %246 = vmatpush.msra.mxu3 %v220_v23 }
  0x2c   :  { %212 = vmatpush.msra.mxu2 %v181_v11  ;;  %247 = vmatpush.msra.mxu3 %v219_v24 }
  0x2e   :  { %248 = vmatpush.msra.mxu3 %v218_v25 }
  0x9a   :  { %v172_v19 = vpop.f32.mrf.mxu1 }
  0x9b   :  { %v148_v18 = vpop.f32.mrf.mxu0 }
  0x9c   :  { %v173_v20 = vadd.f32 %v172_v19, %v148_v18 }
  0x9e   :  { %v179_v21 = vadd.f32 %v288_v17, %v173_v20 }
  0xa0   :  { %v180_v22 = vmax.f32 %v179_v21, 0.0 }
  0xa2   :  { %277 = vmatmul.msk.f32.vlgmr.msra.gmra.mxu2 %vm193_vm3, %v180_v22 }
 0x125   :  { %v214_v27 = vpop.f32.mrf.mxu2 }
 0x126   :  { %v215_v28 = vadd.f32 %v289_v26, %v214_v27 }
 0x128   :  { %v217_v29 = vmax.f32 %v215_v28, 0.0 }
 0x12a   :  { %278 = vmatmul.msk.f32.vlgmr.msra.gmra.mxu3 %vm193_vm3, %v217_v29 }
 0x1ad   :  { %v250_v31 = vpop.f32.mrf.mxu3 }
 0x1ae   :  { %v251_v32 = vadd.f32 %v290_v30, %v250_v31 }
 0x1b0   :  { %253 = vst [vmem:[#allocation13] sm:$0x3] %v251_v32 }
 0x1b1   :  { %264 = dma.vmem_to_hbm [thread:$0]  %s260_s20, 32, %s262_s22, [#allocation4]  }
 0x1b2   :  { %467 = dma.done.wait [#allocation4], 32  }
 0x1b3   :  { %468 = vsyncadd [#allocation4], 4294967264 }
 0x1b4   :  { %269 = vsyncpa [#allocation3], 1 }
 0x1b5   :  { %270 = vsyncpa [#allocation6], 1 }
 0x1b6   :  { %271 = vsyncpa [#allocation9], 1 }
 0x1b7   :  { %272 = vsyncpa [#allocation12], 1 }
 0x1b8   :  { %273 = vsyncpa [#allocation4], 1 }

</bundles_post_ra>
